<compile_context>
chip_gen: v6e
topology: v6e:2x2x1
jax: 0.10.0
libtpu: 0.0.40
codegen_flags: <defaults>
</compile_context>

<pallas_src>
import jax
import jax.numpy as jnp
from jax.experimental import pallas as pl
from jax.experimental.pallas import tpu as pltpu


def _upsample_kernel(x_ref, w_ref, shift_ref, o_ref):
    # x_ref:     (TM, C_in)      flattened pixels of this tile
    # w_ref:     (C_in, C_out)   1x1 conv weight with BN scale pre-folded
    # shift_ref: (1, C_out)      conv bias + BN shift, pre-folded (fp32)
    # o_ref:     (TM, 4*C_out)   lane-dense 2x2 nearest-neighbor duplicates
    y = jnp.dot(x_ref[...], w_ref[...], preferred_element_type=jnp.float32)
    y = y + shift_ref[...]
    y = jnp.where(y > 0, y, 0.1 * y)                     # LeakyReLU(0.1)
    o_ref[...] = jnp.tile(y, (1, 4)).astype(o_ref.dtype)


def _pick_tile(M, cap):
    """Largest divisor of M <= cap that keeps blocks sublane-legal and, when
    possible, leaves >= 2 grid steps (so both v7x TensorCores get work)."""
    cap = max(1, min(cap, M))
    divs = [d for d in range(1, cap + 1) if M % d == 0]
    aligned = [d for d in divs if d % 8 == 0 or d == M]   # (8,128) legality
    multi_step = [d for d in aligned if M // d >= 2]
    if multi_step:
        return max(multi_step)
    if aligned:
        return max(aligned)
    return M


def _fold_params(conv_w, conv_b, gamma, beta, run_mean, run_var, eps, compute_dtype):
    """Fold conv bias + eval-mode BatchNorm into (weight, shift)."""
    C_out, C_in = conv_w.shape[0], conv_w.shape[1]
    inv_std = 1.0 / jnp.sqrt(run_var.astype(jnp.float32) + eps)
    bn_scale = gamma.astype(jnp.float32) * inv_std                       # (C_out,)
    shift = (beta.astype(jnp.float32)
             + (conv_b.astype(jnp.float32) - run_mean.astype(jnp.float32)) * bn_scale)
    w_mat = conv_w.reshape(C_out, C_in).T.astype(jnp.float32)            # (C_in, C_out)
    w_scaled = (w_mat * bn_scale[None, :]).astype(compute_dtype)
    return w_scaled, shift.reshape(1, C_out).astype(jnp.float32)


def _upsample_flat(x_flat, w_scaled, shift, *, tile_cap=1024):
    """(M, C_in) pixels -> (M, 4*C_out) duplicated, activated pixels."""
    M, C_in = x_flat.shape
    C_out = w_scaled.shape[1]
    tm = _pick_tile(M, tile_cap)
    itemsize = jnp.dtype(x_flat.dtype).itemsize

    # double-buffered input + output tiles + params; 2x headroom, capped so the
    # scoped VMEM request stays well inside v7x's 64 MiB physical VMEM.
    vmem_needed = (2 * tm * C_in * itemsize
                   + 2 * tm * 4 * C_out * itemsize
                   + 2 * (C_in * C_out * itemsize + C_out * 4))
    vmem_limit = int(min(48 * 1024 * 1024, max(2 * vmem_needed, 8 * 1024 * 1024)))

    return pl.pallas_call(
        _upsample_kernel,
        out_shape=jax.ShapeDtypeStruct((M, 4 * C_out), x_flat.dtype),
        grid_spec=pltpu.PrefetchScalarGridSpec(
            num_scalar_prefetch=0,
            grid=(M // tm,),
            in_specs=[
                pl.BlockSpec((tm, C_in), lambda i: (i, 0)),
                pl.BlockSpec((C_in, C_out), lambda i: (0, 0)),
                pl.BlockSpec((1, C_out), lambda i: (0, 0)),
            ],
            # sweep knob: pipeline_mode=pl.Buffered(3) on this spec if output
            # DMA writeback is still exposed after the lane-dense change.
            out_specs=pl.BlockSpec((tm, 4 * C_out), lambda i: (i, 0)),
        ),
        compiler_params=pltpu.CompilerParams(
            dimension_semantics=("parallel",),
            vmem_limit_bytes=vmem_limit),
    )(x_flat, w_scaled, shift)


def upsample_forward_nhwc(x_nhwc, conv_w, conv_b, gamma, beta, run_mean, run_var,
                          eps=1e-5, scale_factor=2, tile_cap=1024):
    """Channels-last entry point: (N, H, W, C_in) -> (N, 2H, 2W, C_out).
    No input transpose at all; preferred for production pipelines."""
    assert scale_factor == 2, "kernel hard-codes the 2x2 duplication block"
    N, H, W, C_in = x_nhwc.shape
    C_out = conv_w.shape[0]
    w_scaled, shift = _fold_params(conv_w, conv_b, gamma, beta, run_mean, run_var,
                                   eps, x_nhwc.dtype)
    out = _upsample_flat(x_nhwc.reshape(N * H * W, C_in), w_scaled, shift,
                         tile_cap=tile_cap)
    out = out.reshape(N, H, W, 2, 2, C_out)
    out = jnp.transpose(out, (0, 1, 3, 2, 4, 5)).reshape(N, 2 * H, 2 * W, C_out)
    return out


def upsample_forward(x_nchw, conv_w, conv_b, gamma, beta, run_mean, run_var,
                     eps=1e-5, scale_factor=2, tile_cap=1024):
    """NCHW adapter matching the PyTorch module: (N,C_in,H,W) -> (N,C_out,2H,2W)."""
    # TODO(synk): for production, use upsample_forward_nhwc at a channels-last
    # boundary; the NCHW transposes here cost more HBM traffic than the kernel.
    assert scale_factor == 2, "kernel hard-codes the 2x2 duplication block"
    N, C_in, H, W = x_nchw.shape
    C_out = conv_w.shape[0]
    w_scaled, shift = _fold_params(conv_w, conv_b, gamma, beta, run_mean, run_var,
                                   eps, x_nchw.dtype)

    # NCHW -> (N*H*W, C_in): single input transpose.
    x_flat = jnp.transpose(x_nchw, (0, 2, 3, 1)).reshape(N * H * W, C_in)
    out = _upsample_flat(x_flat, w_scaled, shift, tile_cap=tile_cap)

    # (M, 4*C) -> (N,H,W,dh,dw,C) -> (N,C,H,dh,W,dw) -> NCHW: single transpose.
    out = out.reshape(N, H, W, 2, 2, C_out)
    out = jnp.transpose(out, (0, 5, 1, 3, 2, 4)).reshape(N, C_out, 2 * H, 2 * W)
    return out


def _reference(x_nchw, conv_w, conv_b, gamma, beta, run_mean, run_var, eps=1e-5):
    # pure-JAX reference of the same (eval-mode BN) semantics
    C_out, C_in = conv_w.shape[0], conv_w.shape[1]
    w_mat = conv_w.reshape(C_out, C_in)
    y = jnp.einsum('nchw,oc->nohw', x_nchw, w_mat) + conv_b[None, :, None, None]
    y = (y - run_mean[None, :, None, None]) / jnp.sqrt(run_var + eps)[None, :, None, None]
    y = y * gamma[None, :, None, None] + beta[None, :, None, None]
    y = jnp.where(y > 0, y, 0.1 * y)
    y = jnp.repeat(jnp.repeat(y, 2, axis=2), 2, axis=3)   # nearest upsample x2
    return y


if __name__ == "__main__":
    # TODO(synk): BatchNorm is evaluated with running statistics (eval mode);
    # training-mode batch statistics are not reproduced. torch checkpoint() is
    # a no-op for the forward pass.
    key = jax.random.PRNGKey(0)
    k_x, k_w, k_b, k_g, k_be, k_m, k_v = jax.random.split(key, 7)

    N, C_in, C_out, H, W = 2, 4, 8, 16, 16
    x = jax.random.normal(k_x, (N, C_in, H, W), dtype=jnp.float32)
    conv_w = jax.random.normal(k_w, (C_out, C_in, 1, 1), dtype=jnp.float32) * 0.1
    conv_b = jax.random.normal(k_b, (C_out,), dtype=jnp.float32) * 0.1
    gamma = 1.0 + 0.1 * jax.random.normal(k_g, (C_out,), dtype=jnp.float32)
    beta = 0.1 * jax.random.normal(k_be, (C_out,), dtype=jnp.float32)
    run_mean = 0.1 * jax.random.normal(k_m, (C_out,), dtype=jnp.float32)
    run_var = jnp.abs(jax.random.normal(k_v, (C_out,), dtype=jnp.float32)) + 0.5

    out = upsample_forward(x, conv_w, conv_b, gamma, beta, run_mean, run_var)
    out = jax.block_until_ready(out)

    ref = _reference(x, conv_w, conv_b, gamma, beta, run_mean, run_var)
    assert out.shape == (N, C_out, 2 * H, 2 * W), out.shape
    assert jnp.allclose(out, ref, atol=1e-4, rtol=1e-4), \
        float(jnp.max(jnp.abs(out - ref)))

    # also exercise the channels-last entry point (no input transpose)
    out_nhwc = upsample_forward_nhwc(jnp.transpose(x, (0, 2, 3, 1)),
                                     conv_w, conv_b, gamma, beta, run_mean, run_var)
    out_nhwc = jax.block_until_ready(out_nhwc)
    assert jnp.allclose(jnp.transpose(out_nhwc, (0, 3, 1, 2)), ref,
                        atol=1e-4, rtol=1e-4)

    print("KERNEL_OK")
</pallas_src>

<mosaic_0001>
module attributes {stable_mosaic.version = 11 : i64} {
  func.func @_upsample_kernel(%arg0: i32, %arg1: memref<256x4xf32, #tpu.memory_space<vmem>>, %arg2: memref<4x8xf32, #tpu.memory_space<vmem>>, %arg3: memref<1x8xf32, #tpu.memory_space<vmem>>, %arg4: memref<256x32xf32, #tpu.memory_space<vmem>>) attributes {dimension_semantics = [#tpu.dimension_semantics<parallel>], iteration_bounds = array<i64: 2>, scalar_prefetch = 0 : i64, scratch_operands = 0 : i64, tpu.core_type = #tpu.core_type<tc>, window_params = [{transform_indices = @transform_0, window_bounds = array<i64: 256, 4>}, {pipeline_mode = #tpu.pipeline_mode<synchronous>, transform_indices = @transform_1, window_bounds = array<i64: 4, 8>}, {pipeline_mode = #tpu.pipeline_mode<synchronous>, transform_indices = @transform_2, window_bounds = array<i64: 1, 8>}, {transform_indices = @transform_3, window_bounds = array<i64: 256, 32>}]} {
    %c0 = arith.constant 0 : index
    %c0_0 = arith.constant 0 : index
    %0 = vector.load %arg1[%c0, %c0_0] : memref<256x4xf32, #tpu.memory_space<vmem>>, vector<256x4xf32>
    %c0_1 = arith.constant 0 : index
    %c0_2 = arith.constant 0 : index
    %1 = vector.load %arg2[%c0_1, %c0_2] : memref<4x8xf32, #tpu.memory_space<vmem>>, vector<4x8xf32>
    %cst = arith.constant dense<0.000000e+00> : vector<256x8xf32>
    %2 = tpu.matmul %0, %1, %cst {dimension_numbers = #tpu.dot_dimension_numbers<[1], [0], [0], [1], [0, 0, 1, 1], [], []>} : vector<256x4xf32>, vector<4x8xf32>, vector<256x8xf32> -> vector<256x8xf32>
    %c0_3 = arith.constant 0 : index
    %c0_4 = arith.constant 0 : index
    %3 = vector.load %arg3[%c0_3, %c0_4] : memref<1x8xf32, #tpu.memory_space<vmem>>, vector<1x8xf32>
    %4 = vector.broadcast %3 : vector<1x8xf32> to vector<256x8xf32>
    %5 = arith.addf %2, %4 : vector<256x8xf32>
    %cst_5 = arith.constant 0.000000e+00 : f32
    %6 = vector.broadcast %cst_5 : f32 to vector<256x8xf32>
    %7 = arith.cmpf ogt, %5, %6 : vector<256x8xf32>
    %cst_6 = arith.constant 1.000000e-01 : f32
    %8 = vector.broadcast %cst_6 : f32 to vector<256x8xf32>
    %9 = arith.mulf %8, %5 : vector<256x8xf32>
    %10 = arith.select %7, %5, %9 : vector<256x8xi1>, vector<256x8xf32>
    %11 = tpu.concatenate %10, %10, %10, %10 in 1 : vector<256x8xf32>, vector<256x8xf32>, vector<256x8xf32>, vector<256x8xf32> -> vector<256x32xf32>
    %c0_7 = arith.constant 0 : index
    %c0_8 = arith.constant 0 : index
    %12 = vector.load %arg4[%c0_7, %c0_8] : memref<256x32xf32, #tpu.memory_space<vmem>>, vector<256x32xf32>
    tpu.vector_store %arg4[%c0_7, %c0_8], %11 {strides = array<i32>} : memref<256x32xf32, #tpu.memory_space<vmem>>, vector<256x32xf32>,
    return
  }
  func.func @transform_0(%arg0: i32) -> (i32, i32) {
    %c0_i32 = arith.constant 0 : i32
    %c0_i32_0 = arith.constant 0 : i32
    return %arg0, %c0_i32 : i32, i32
  }
  func.func @transform_1(%arg0: i32) -> (i32, i32) {
    %c0_i32 = arith.constant 0 : i32
    %c0_i32_0 = arith.constant 0 : i32
    %c0_i32_1 = arith.constant 0 : i32
    return %c0_i32, %c0_i32_0 : i32, i32
  }
  func.func @transform_2(%arg0: i32) -> (i32, i32) {
    %c0_i32 = arith.constant 0 : i32
    %c0_i32_0 = arith.constant 0 : i32
    %c0_i32_1 = arith.constant 0 : i32
    return %c0_i32, %c0_i32_0 : i32, i32
  }
  func.func @transform_3(%arg0: i32) -> (i32, i32) {
    %c0_i32 = arith.constant 0 : i32
    %c0_i32_0 = arith.constant 0 : i32
    return %arg0, %c0_i32 : i32, i32
  }
}

</mosaic_0001>

<bundles_post_ra>
// kernel: tpu_custom_call.1
= control target key start
LH: loop header
LB: loop body
LE: loop exit
PB: predicated region body
PF: predicated region fallthrough
CT: control target
= control target key end

     0   :  { %s1316_s12 = smov 0   ;;  %s1896_s0 = inlined_call_operand.vmem [shape: f32[512,4], index: 0, kind: input, shape index: {}]   ;;  %s1897_s1 = inlined_call_operand.vmem [shape: f32[4,8], index: 1, kind: input, shape index: {}]   ;;  %s1898_s2 = inlined_call_operand.vmem [shape: f32[1,8], index: 2, kind: input, shape index: {}]   ;;  %s1899_s3 = inlined_call_operand.vmem [shape: f32[512,32], index: 3, kind: output, shape index: {}]  }
   0x1 LB: > { %s1144_s13 = sadd.s32 4294967295, %s1291_s12   ;;  %p1148_p0 = scmp.ge.s32.totalorder %s1291_s12, 1  ;;  %s1291_s12 = sphi %s1316_s12, %s13_s12  }
   0x2   : > { %p138_p1 = scmp.lt.s32.totalorder %s1291_s12, 3 }
   0x4   : > { %p139_p2 = pnand %p1148_p0, %p138_p1 }
   0x5   : > { %s1149_s16 = sshll.u32 (!%p139_p2), %s1144_s13, 5  ;;  %s1293_s23 = smov (!%p139_p2), 8  }
   0x6   : > { %142 = sbr.rel (%p139_p2) target bundleno = 520 (0x208), region = 32  ;;  %p163_p3 = scmp.lt.s32.totalorder (!%p139_p2), %s1149_s16, 63 }
   0x7   : > { %s1294_s24 = smov (!%p139_p2), 16   ;;  %s1295_s25 = smov (!%p139_p2), 24  }
   0xb   : > { %v206_v0 = vld [vmem:[%s1897_s1] sm:$0xf]  ;;  %vm311_vm0 = vcmask 1043456   ;;  %s1901_s16 = smov (!%p163_p3, %s1149_s16), 63  ;;  %vm214_vm1 = vcmask 31744  }
   0xc   : > { %1222 = vmatprep.subr.msk.mxu0 %vm311_vm0, %v206_v0  ;;  %1272 = vmatprep.subr.msk.mxu1 %vm311_vm0, %v206_v0  ;;  %s1150_s17 = sshll.u32 %s1901_s16, 3  ;;  %v1404_v33 = vld [vmem:[%s1898_s2] ss:$0 sm:$0xff] }
   0xd   : > { %1223 = vmatpush3.msk.msra.mxu0 %vm311_vm0, %v206_v0  ;;  %1273 = vmatpush3.msk.msra.mxu1 %vm311_vm0, %v206_v0  ;;  %s1335_s20 = scalar_lea.vmem %s1896_s0, %s1150_s17  ;;  %s1611_s28 = scalar_lea.vmem %s1899_s3, %s1150_s17 }
   0xe   : > { %v174_v1 = vld [vmem:[%s1335_s20] sm:$0xff]  ;;  %v175_v3 = vld [vmem:[%s1335_s20 + $0x8] sm:$0xff]  ;;  %v176_v5 = vld [vmem:[%s1335_s20 + $0x10] sm:$0xff] }
   0xf   : > { %v190_v2 = vld [vmem:[%s1335_s20 + $0x80] sm:$0xff]  ;;  %1224 = vmatprep.mubr.msk.f32.mxu0 %vm214_vm1, %v174_v1  ;;  %v191_v4 = vld [vmem:[%s1335_s20 + $0x88] sm:$0xff]  ;;  %v192_v6 = vld [vmem:[%s1335_s20 + $0x90] sm:$0xff] }
  0x10   : > { %1248 = vmatprep.mubr.msk.f32.mxu1 %vm214_vm1, %v190_v2  ;;  %1225 = vmatmul.mubr.msk.f32.vlgmr.msra.gmra.mxu0 %vm214_vm1, %v175_v3  ;;  %v177_v7 = vld [vmem:[%s1335_s20 + $0x18] sm:$0xff]  ;;  %v178_v9 = vld [vmem:[%s1335_s20 + $0x20] sm:$0xff]  ;;  %v179_v11 = vld [vmem:[%s1335_s20 + $0x28] sm:$0xff] }
  0x11   : > { %1249 = vmatmul.mubr.msk.f32.vlgmr.msra.gmra.mxu1 %vm214_vm1, %v191_v4  ;;  %1227 = vmatprep.mubr.msk.f32.mxu0 %vm214_vm1, %v176_v5  ;;  %v193_v8 = vld [vmem:[%s1335_s20 + $0x98] sm:$0xff]  ;;  %v194_v10 = vld [vmem:[%s1335_s20 + $0xa0] sm:$0xff]  ;;  %v195_v12 = vld [vmem:[%s1335_s20 + $0xa8] sm:$0xff] }
  0x12   : > { %1251 = vmatprep.mubr.msk.f32.mxu1 %vm214_vm1, %v192_v6  ;;  %v180_v13 = vld [vmem:[%s1335_s20 + $0x30] sm:$0xff]  ;;  %v181_v15 = vld [vmem:[%s1335_s20 + $0x38] sm:$0xff]  ;;  %v182_v17 = vld [vmem:[%s1335_s20 + $0x40] sm:$0xff] }
  0x13   : > { %v196_v14 = vld [vmem:[%s1335_s20 + $0xb0] sm:$0xff]  ;;  %v197_v16 = vld [vmem:[%s1335_s20 + $0xb8] sm:$0xff]  ;;  %v198_v18 = vld [vmem:[%s1335_s20 + $0xc0] sm:$0xff] }
  0x14   : > { %1228 = vmatmul.mubr.msk.f32.gmra.mxu0 %vm214_vm1, %v177_v7  ;;  %v183_v19 = vld [vmem:[%s1335_s20 + $0x48] sm:$0xff]  ;;  %v184_v21 = vld [vmem:[%s1335_s20 + $0x50] sm:$0xff]  ;;  %v185_v23 = vld [vmem:[%s1335_s20 + $0x58] sm:$0xff] }
  0x15   : > { %1252 = vmatmul.mubr.msk.f32.gmra.mxu1 %vm214_vm1, %v193_v8  ;;  %1230 = vmatprep.mubr.msk.f32.mxu0 %vm214_vm1, %v178_v9  ;;  %v199_v20 = vld [vmem:[%s1335_s20 + $0xc8] sm:$0xff]  ;;  %v200_v22 = vld [vmem:[%s1335_s20 + $0xd0] sm:$0xff]  ;;  %v201_v24 = vld [vmem:[%s1335_s20 + $0xd8] sm:$0xff] }
  0x16   : > { %1254 = vmatprep.mubr.msk.f32.mxu1 %vm214_vm1, %v194_v10  ;;  %v186_v25 = vld [vmem:[%s1335_s20 + $0x60] sm:$0xff]  ;;  %v187_v27 = vld [vmem:[%s1335_s20 + $0x68] sm:$0xff]  ;;  %v188_v29 = vld [vmem:[%s1335_s20 + $0x70] sm:$0xff] }
  0x17   : > { %v202_v26 = vld [vmem:[%s1335_s20 + $0xe0] sm:$0xff]  ;;  %v203_v28 = vld [vmem:[%s1335_s20 + $0xe8] sm:$0xff]  ;;  %v204_v30 = vld [vmem:[%s1335_s20 + $0xf0] sm:$0xff] }
  0x18   : > { %1231 = vmatmul.mubr.msk.f32.gmra.mxu0 %vm214_vm1, %v179_v11  ;;  %v189_v31 = vld [vmem:[%s1335_s20 + $0x78] sm:$0xff] }
  0x19   : > { %1255 = vmatmul.mubr.msk.f32.gmra.mxu1 %vm214_vm1, %v195_v12  ;;  %1233 = vmatprep.mubr.msk.f32.mxu0 %vm214_vm1, %v180_v13  ;;  %v205_v32 = vld [vmem:[%s1335_s20 + $0xf8] sm:$0xff] }
  0x1a   : > { %1257 = vmatprep.mubr.msk.f32.mxu1 %vm214_vm1, %v196_v14 }
  0x1c   : > { %1234 = vmatmul.mubr.msk.f32.gmra.mxu0 %vm214_vm1, %v181_v15 }
  0x1d   : > { %1258 = vmatmul.mubr.msk.f32.gmra.mxu1 %vm214_vm1, %v197_v16  ;;  %1236 = vmatprep.mubr.msk.f32.mxu0 %vm214_vm1, %v182_v17 }
  0x1e   : > { %1260 = vmatprep.mubr.msk.f32.mxu1 %vm214_vm1, %v198_v18 }
  0x20   : > { %1237 = vmatmul.mubr.msk.f32.gmra.mxu0 %vm214_vm1, %v183_v19 }
  0x21   : > { %1261 = vmatmul.mubr.msk.f32.gmra.mxu1 %vm214_vm1, %v199_v20  ;;  %1239 = vmatprep.mubr.msk.f32.mxu0 %vm214_vm1, %v184_v21 }
  0x22   : > { %1263 = vmatprep.mubr.msk.f32.mxu1 %vm214_vm1, %v200_v22 }
  0x24   : > { %1240 = vmatmul.mubr.msk.f32.gmra.mxu0 %vm214_vm1, %v185_v23 }
  0x25   : > { %1264 = vmatmul.mubr.msk.f32.gmra.mxu1 %vm214_vm1, %v201_v24  ;;  %1242 = vmatprep.mubr.msk.f32.mxu0 %vm214_vm1, %v186_v25 }
  0x26   : > { %1266 = vmatprep.mubr.msk.f32.mxu1 %vm214_vm1, %v202_v26 }
  0x28   : > { %1243 = vmatmul.mubr.msk.f32.gmra.mxu0 %vm214_vm1, %v187_v27 }
  0x29   : > { %1267 = vmatmul.mubr.msk.f32.gmra.mxu1 %vm214_vm1, %v203_v28  ;;  %1245 = vmatprep.mubr.msk.f32.mxu0 %vm214_vm1, %v188_v29 }
  0x2a   : > { %1269 = vmatprep.mubr.msk.f32.mxu1 %vm214_vm1, %v204_v30 }
  0x2c   : > { %1246 = vmatmul.mubr.msk.f32.gmra.mxu0 %vm214_vm1, %v189_v31 }
  0x2d   : > { %1270 = vmatmul.mubr.msk.f32.gmra.mxu1 %vm214_vm1, %v205_v32 }
  0xd0   : > { %v1226_v34 = vpop.f32.mrf.mxu0 }
  0xd1   : > { %v1250_v35 = vpop.f32.mrf.mxu1  ;;  %v387_v36 = vadd.f32 %v1226_v34, %v1404_v33 }
  0xd2   : > { %v467_v37 = vadd.f32 %v1250_v35, %v1404_v33  ;;  %v381_v38 = vpop.f32.mrf.mxu0 }
  0xd3   : > { %v461_v39 = vpop.f32.mrf.mxu1  ;;  %vm541_vm2 = vcmp.gt.f32.partialorder %v387_v36, 0.0  ;;  %v573_v40 = vmul.f32 0.1, %v387_v36  ;;  %v382_v42 = vadd.f32 %v1404_v33, %v381_v38 }
  0xd4   : > { %vm557_vm3 = vcmp.gt.f32.partialorder %v467_v37, 0.0  ;;  %v589_v41 = vmul.f32 0.1, %v467_v37  ;;  %v462_v43 = vadd.f32 %v1404_v33, %v461_v39  ;;  %v1229_v50 = vpop.f32.mrf.mxu0 }
  0xd5   : > { %v1412_v45 = vsel %vm541_vm2, %v387_v36, %v573_v40  ;;  %vm540_vm4 = vcmp.gt.f32.partialorder %v382_v42, 0.0  ;;  %v572_v46 = vmul.f32 0.1, %v382_v42  ;;  %v397_v51 = vadd.f32 %v1229_v50, %v1404_v33  ;;  %v1253_v52 = vpop.f32.mrf.mxu1 }
  0xd6   : > { %v1410_v44 = vsel %vm557_vm3, %v467_v37, %v589_v41  ;;  %670 = vrot.lane.b32.xlu0 %v1412_v45, %s1293_s23  ;;  %v588_v47 = vmul.f32 0.1, %v462_v43  ;;  %vm556_vm5 = vcmp.gt.f32.partialorder %v462_v43, 0.0  ;;  %v477_v54 = vadd.f32 %v1253_v52, %v1404_v33  ;;  %v391_v59 = vpop.f32.mrf.mxu0 }
  0xd7   : > { %702 = vrot.lane.b32.xlu1 %v1410_v44, %s1293_s23  ;;  %v1418_v48 = vsel %vm540_vm4, %v382_v42, %v572_v46  ;;  %v575_v53 = vmul.f32 0.1, %v397_v51  ;;  %vm543_vm6 = vcmp.gt.f32.partialorder %v397_v51, 0.0  ;;  %v471_v55 = vpop.f32.mrf.mxu1  ;;  %v392_v60 = vadd.f32 %v1404_v33, %v391_v59 }
  0xd8   : > { %v1424_v49 = vsel %vm556_vm5, %v462_v43, %v588_v47  ;;  %v591_v56 = vmul.f32 0.1, %v477_v54  ;;  %v472_v57 = vadd.f32 %v1404_v33, %v471_v55  ;;  %vm559_vm7 = vcmp.gt.f32.partialorder %v477_v54, 0.0  ;;  %v1232_v2 = vpop.f32.mrf.mxu0 }
  0xd9   : > { %v1441_v58 = vsel %vm543_vm6, %v397_v51, %v575_v53  ;;  %v574_v63 = vmul.f32 0.1, %v392_v60  ;;  %vm542_vm9 = vcmp.gt.f32.partialorder %v392_v60, 0.0  ;;  %v1256_v4 = vpop.f32.mrf.mxu1  ;;  %v407_v5 = vadd.f32 %v1232_v2, %v1404_v33 }
  0xda   : > { %668 = vrot.lane.b32.xlu0 %v1418_v48, %s1293_s23  ;;  %v590_v61 = vmul.f32 0.1, %v472_v57  ;;  %v1448_v62 = vsel %vm559_vm7, %v477_v54, %v591_v56  ;;  %vm558_vm8 = vcmp.gt.f32.partialorder %v472_v57, 0.0  ;;  %v401_v3 = vpop.f32.mrf.mxu0  ;;  %v487_v10 = vadd.f32 %v1256_v4, %v1404_v33 }
  0xdb   : > { %766 = vrot.lane.b32.xlu1 %v1412_v45, %s1294_s24  ;;  %v1460_v1 = vsel %vm542_vm9, %v392_v60, %v574_v63  ;;  %v402_v6 = vadd.f32 %v1404_v33, %v401_v3  ;;  %v481_v7 = vpop.f32.mrf.mxu1  ;;  %v577_v8 = vmul.f32 0.1, %v407_v5  ;;  %vm545_vm10 = vcmp.gt.f32.partialorder %v407_v5, 0.0 }
  0xdc   : > { %v1454_v0 = vsel %vm558_vm8, %v472_v57, %v590_v61  ;;  %v482_v11 = vadd.f32 %v1404_v33, %v481_v7  ;;  %v593_v12 = vmul.f32 0.1, %v487_v10  ;;  %vm561_vm12 = vcmp.gt.f32.partialorder %v487_v10, 0.0  ;;  %v1235_v18 = vpop.f32.mrf.mxu0 }
  0xdd   : > { %v576_v9 = vmul.f32 0.1, %v402_v6  ;;  %vm544_vm11 = vcmp.gt.f32.partialorder %v402_v6, 0.0  ;;  %v1482_v14 = vsel %vm545_vm10, %v407_v5, %v577_v8  ;;  %v1259_v20 = vpop.f32.mrf.mxu1  ;;  %v417_v21 = vadd.f32 %v1235_v18, %v1404_v33 }
  0xde   : > { %700 = vrot.lane.b32.xlu0 %v1424_v49, %s1293_s23  ;;  %v592_v13 = vmul.f32 0.1, %v482_v11  ;;  %vm560_vm13 = vcmp.gt.f32.partialorder %v482_v11, 0.0  ;;  %v1490_v16 = vsel %vm561_vm12, %v487_v10, %v593_v12  ;;  %v411_v19 = vpop.f32.mrf.mxu0  ;;  %v497_v26 = vadd.f32 %v1259_v20, %v1404_v33 }
  0xdf   : > { %798 = vrot.lane.b32.xlu1 %v1410_v44, %s1294_s24  ;;  %v1484_v15 = vsel %vm544_vm11, %v402_v6, %v576_v9  ;;  %v412_v22 = vadd.f32 %v1404_v33, %v411_v19  ;;  %v491_v23 = vpop.f32.mrf.mxu1  ;;  %v579_v24 = vmul.f32 0.1, %v417_v21  ;;  %vm547_vm14 = vcmp.gt.f32.partialorder %v417_v21, 0.0 }
  0xe0   : > { %v1492_v17 = vsel %vm560_vm13, %v482_v11, %v592_v13  ;;  %v492_v27 = vadd.f32 %v1404_v33, %v491_v23  ;;  %v595_v28 = vmul.f32 0.1, %v497_v26  ;;  %vm563_vm0 = vcmp.gt.f32.partialorder %v497_v26, 0.0  ;;  %v1238_v35 = vpop.f32.mrf.mxu0 }
  0xe1   : > { %v578_v25 = vmul.f32 0.1, %v412_v22  ;;  %vm546_vm15 = vcmp.gt.f32.partialorder %v412_v22, 0.0  ;;  %v1518_v30 = vsel %vm547_vm14, %v417_v21, %v579_v24  ;;  %v1262_v37 = vpop.f32.mrf.mxu1  ;;  %v427_v38 = vadd.f32 %v1238_v35, %v1404_v33 }
  0xe2   : > { %764 = vrot.lane.b32.xlu0 %v1418_v48, %s1294_s24  ;;  %v594_v29 = vmul.f32 0.1, %v492_v27  ;;  %vm562_vm1 = vcmp.gt.f32.partialorder %v492_v27, 0.0  ;;  %v1526_v32 = vsel %vm563_vm0, %v497_v26, %v595_v28  ;;  %v421_v36 = vpop.f32.mrf.mxu0  ;;  %v507_v43 = vadd.f32 %v1262_v37, %v1404_v33 }
  0xe3   : > { %862 = vrot.lane.b32.xlu1 %v1412_v45, %s1295_s25  ;;  %v1520_v31 = vsel %vm546_vm15, %v412_v22, %v578_v25  ;;  %v422_v39 = vadd.f32 %v1404_v33, %v421_v36  ;;  %v501_v40 = vpop.f32.mrf.mxu1  ;;  %v581_v41 = vmul.f32 0.1, %v427_v38  ;;  %vm549_vm2 = vcmp.gt.f32.partialorder %v427_v38, 0.0 }
  0xe4   : > { %v1528_v34 = vsel %vm562_vm1, %v492_v27, %v594_v29  ;;  %v502_v46 = vadd.f32 %v1404_v33, %v501_v40  ;;  %v597_v47 = vmul.f32 0.1, %v507_v43  ;;  %vm565_vm4 = vcmp.gt.f32.partialorder %v507_v43, 0.0  ;;  %v1241_v55 = vpop.f32.mrf.mxu0 }
  0xe5   : > { %v580_v42 = vmul.f32 0.1, %v422_v39  ;;  %vm548_vm3 = vcmp.gt.f32.partialorder %v422_v39, 0.0  ;;  %v1554_v51 = vsel %vm549_vm2, %v427_v38, %v581_v41  ;;  %v1265_v57 = vpop.f32.mrf.mxu1  ;;  %v437_v59 = vadd.f32 %v1241_v55, %v1404_v33 }
  0xe6   : > { %796 = vrot.lane.b32.xlu0 %v1424_v49, %s1294_s24  ;;  %v596_v50 = vmul.f32 0.1, %v502_v46  ;;  %vm564_vm5 = vcmp.gt.f32.partialorder %v502_v46, 0.0  ;;  %v1562_v53 = vsel %vm565_vm4, %v507_v43, %v597_v47  ;;  %v431_v56 = vpop.f32.mrf.mxu0  ;;  %v517_v5 = vadd.f32 %v1265_v57, %v1404_v33 }
  0xe7   : > { %894 = vrot.lane.b32.xlu1 %v1410_v44, %s1295_s25  ;;  %v1556_v52 = vsel %vm548_vm3, %v422_v39, %v580_v42  ;;  %v432_v60 = vadd.f32 %v1404_v33, %v431_v56  ;;  %v511_v61 = vpop.f32.mrf.mxu1  ;;  %v583_v3 = vmul.f32 0.1, %v437_v59  ;;  %vm551_vm6 = vcmp.gt.f32.partialorder %v437_v59, 0.0 }
  0xe8   : > { %v1564_v54 = vsel %vm564_vm5, %v502_v46, %v596_v50  ;;  %v512_v6 = vadd.f32 %v1404_v33, %v511_v61  ;;  %v599_v9 = vmul.f32 0.1, %v517_v5  ;;  %vm567_vm8 = vcmp.gt.f32.partialorder %v517_v5, 0.0  ;;  %v1244_v26 = vpop.f32.mrf.mxu0 }
  0xe9   : > { %v582_v4 = vmul.f32 0.1, %v432_v60  ;;  %vm550_vm7 = vcmp.gt.f32.partialorder %v432_v60, 0.0  ;;  %v1590_v11 = vsel %vm551_vm6, %v437_v59, %v583_v3  ;;  %vm956_vm10 = vcmask 64512   ;;  %v1268_v37 = vpop.f32.mrf.mxu1 }
  0xea   : > { %860 = vrot.lane.b32.xlu0 %v1418_v48, %s1295_s25  ;;  %v598_v10 = vmul.f32 0.1, %v512_v6  ;;  %vm566_vm9 = vcmp.gt.f32.partialorder %v512_v6, 0.0  ;;  %vm989_vm11 = vcmask 130048   ;;  %v1598_v19 = vsel %vm567_vm8, %v517_v5, %v599_v9  ;;  %v441_v36 = vpop.f32.mrf.mxu0 }
  0xeb   : > { %674 = vrot.lane.b32.xlu1 %v1441_v58, %s1293_s23  ;;  %v1592_v12 = vsel %vm550_vm7, %v432_v60, %v582_v4  ;;  %vm1022_vm12 = vcmask 195584   ;;  %vm1055_vm13 = vcmask 261120   ;;  %v447_v41 = vadd.f32 %v1244_v26, %v1404_v33 }
  0xec   : > { %v1600_v20 = vsel %vm566_vm9, %v512_v6, %v598_v10  ;;  %v442_v42 = vadd.f32 %v1404_v33, %v441_v36  ;;  %v527_v50 = vadd.f32 %v1268_v37, %v1404_v33 }
  0xed   : > { %v585_v57 = vmul.f32 0.1, %v447_v41  ;;  %vm553_vm14 = vcmp.gt.f32.partialorder %v447_v41, 0.0 }
  0xee   : > { %892 = vrot.lane.b32.xlu0 %v1424_v49, %s1295_s25  ;;  %v584_v59 = vmul.f32 0.1, %v442_v42  ;;  %vm552_vm15 = vcmp.gt.f32.partialorder %v442_v42, 0.0  ;;  %vm569_vm0 = vcmp.gt.f32.partialorder %v527_v50, 0.0 }
  0xef   : > { %706 = vrot.lane.b32.xlu1 %v1448_v62, %s1293_s23  ;;  %v1657_v4 = vsel %vm553_vm14, %v447_v41, %v585_v57 }
  0xf0   : > { %v1659_v5 = vsel %vm552_vm15, %v442_v42, %v584_v59 }
  0xf2   : > { %704 = vrot.lane.b32.xlu0 %v1454_v0, %s1293_s23 }
  0xf3   : > { %770 = vrot.lane.b32.xlu1 %v1441_v58, %s1294_s24 }
  0xf6   : > { %768 = vrot.lane.b32.xlu0 %v1460_v1, %s1294_s24 }
  0xf7   : > { %802 = vrot.lane.b32.xlu1 %v1448_v62, %s1294_s24 }
  0xfa   : > { %800 = vrot.lane.b32.xlu0 %v1454_v0, %s1294_s24 }
  0xfb   : > { %866 = vrot.lane.b32.xlu1 %v1441_v58, %s1295_s25 }
  0xfe   : > { %864 = vrot.lane.b32.xlu0 %v1460_v1, %s1295_s25 }
  0xff   : > { %898 = vrot.lane.b32.xlu1 %v1448_v62, %s1295_s25 }
 0x102   : > { %896 = vrot.lane.b32.xlu0 %v1454_v0, %s1295_s25 }
 0x103   : > { %672 = vrot.lane.b32.xlu1 %v1460_v1, %s1293_s23 }
 0x106   : > { %676 = vrot.lane.b32.xlu0 %v1484_v15, %s1293_s23 }
 0x107   : > { %678 = vrot.lane.b32.xlu1 %v1482_v14, %s1293_s23 }
 0x10a   : > { %708 = vrot.lane.b32.xlu0 %v1492_v17, %s1293_s23 }
 0x10b   : > { %710 = vrot.lane.b32.xlu1 %v1490_v16, %s1293_s23 }
 0x10e   : > { %772 = vrot.lane.b32.xlu0 %v1484_v15, %s1294_s24 }
 0x10f   : > { %774 = vrot.lane.b32.xlu1 %v1482_v14, %s1294_s24 }
 0x112   : > { %804 = vrot.lane.b32.xlu0 %v1492_v17, %s1294_s24 }
 0x113   : > { %806 = vrot.lane.b32.xlu1 %v1490_v16, %s1294_s24 }
 0x116   : > { %868 = vrot.lane.b32.xlu0 %v1484_v15, %s1295_s25 }
 0x117   : > { %870 = vrot.lane.b32.xlu1 %v1482_v14, %s1295_s25 }
 0x11a   : > { %900 = vrot.lane.b32.xlu0 %v1492_v17, %s1295_s25 }
 0x11b   : > { %902 = vrot.lane.b32.xlu1 %v1490_v16, %s1295_s25 }
 0x11e   : > { %680 = vrot.lane.b32.xlu0 %v1520_v31, %s1293_s23 }
 0x11f   : > { %682 = vrot.lane.b32.xlu1 %v1518_v30, %s1293_s23 }
 0x122   : > { %712 = vrot.lane.b32.xlu0 %v1528_v34, %s1293_s23 }
 0x123   : > { %714 = vrot.lane.b32.xlu1 %v1526_v32, %s1293_s23 }
 0x126   : > { %776 = vrot.lane.b32.xlu0 %v1520_v31, %s1294_s24 }
 0x127   : > { %778 = vrot.lane.b32.xlu1 %v1518_v30, %s1294_s24 }
 0x12a   : > { %808 = vrot.lane.b32.xlu0 %v1528_v34, %s1294_s24 }
 0x12b   : > { %810 = vrot.lane.b32.xlu1 %v1526_v32, %s1294_s24 }
 0x12e   : > { %872 = vrot.lane.b32.xlu0 %v1520_v31, %s1295_s25 }
 0x12f   : > { %874 = vrot.lane.b32.xlu1 %v1518_v30, %s1295_s25 }
 0x132   : > { %904 = vrot.lane.b32.xlu0 %v1528_v34, %s1295_s25 }
 0x133   : > { %906 = vrot.lane.b32.xlu1 %v1526_v32, %s1295_s25 }
 0x136   : > { %684 = vrot.lane.b32.xlu0 %v1556_v52, %s1293_s23 }
 0x137   : > { %686 = vrot.lane.b32.xlu1 %v1554_v51, %s1293_s23 }
 0x13a   : > { %716 = vrot.lane.b32.xlu0 %v1564_v54, %s1293_s23 }
 0x13b   : > { %718 = vrot.lane.b32.xlu1 %v1562_v53, %s1293_s23 }
 0x13e   : > { %780 = vrot.lane.b32.xlu0 %v1556_v52, %s1294_s24 }
 0x13f   : > { %782 = vrot.lane.b32.xlu1 %v1554_v51, %s1294_s24 }
 0x142   : > { %812 = vrot.lane.b32.xlu0 %v1564_v54, %s1294_s24 }
 0x143   : > { %814 = vrot.lane.b32.xlu1 %v1562_v53, %s1294_s24 }
 0x146   : > { %876 = vrot.lane.b32.xlu0 %v1556_v52, %s1295_s25 }
 0x147   : > { %878 = vrot.lane.b32.xlu1 %v1554_v51, %s1295_s25 }
 0x148   : > { %v671_v2 = vpop.permute.xlu0 %670 }
 0x149   : > { %v703_v63 = vpop.permute.xlu1 %702  ;;  %v958_v21 = vsel %vm956_vm10, %v1412_v45, %v671_v2  ;;  %v601_v2 = vmul.f32 0.1, %v527_v50 }
 0x14a   : > { %908 = vrot.lane.b32.xlu0 %v1564_v54, %s1295_s25  ;;  %v974_v27 = vsel %vm956_vm10, %v1410_v44, %v703_v63 }
 0x14b   : > { %910 = vrot.lane.b32.xlu1 %v1562_v53, %s1295_s25 }
 0x14c   : > { %v669_v8 = vpop.permute.xlu0 %668 }
 0x14d   : > { %v767_v7 = vpop.permute.xlu1 %766  ;;  %v957_v44 = vsel %vm956_vm10, %v1418_v48, %v669_v8  ;;  %v521_v48 = vpop.f32.mrf.mxu1  ;;  %v1665_v8 = vsel %vm569_vm0, %v527_v50, %v601_v2 }
 0x14e   : > { %688 = vrot.lane.b32.xlu0 %v1592_v12, %s1293_s23  ;;  %v991_v22 = vsel %vm989_vm11, %v958_v21, %v767_v7  ;;  %v522_v60 = vadd.f32 %v1404_v33, %v521_v48 }
 0x14f   : > { %690 = vrot.lane.b32.xlu1 %v1590_v11, %s1293_s23 }
 0x150   : > { %v701_v18 = vpop.permute.xlu0 %700  ;;  %v600_v3 = vmul.f32 0.1, %v522_v60  ;;  %vm568_vm1 = vcmp.gt.f32.partialorder %v522_v60, 0.0 }
 0x151   : > { %v799_v13 = vpop.permute.xlu1 %798  ;;  %v973_v46 = vsel %vm956_vm10, %v1424_v49, %v701_v18 }
 0x152   : > { %720 = vrot.lane.b32.xlu0 %v1600_v20, %s1293_s23  ;;  %v1007_v45 = vsel %vm989_vm11, %v974_v27, %v799_v13  ;;  %v1667_v9 = vsel %vm568_vm1, %v522_v60, %v600_v3 }
 0x153   : > { %722 = vrot.lane.b32.xlu1 %v1598_v19, %s1293_s23 }
 0x154   : > { %v765_v24 = vpop.permute.xlu0 %764 }
 0x155   : > { %v863_v23 = vpop.permute.xlu1 %862  ;;  %v990_v38 = vsel %vm989_vm11, %v957_v44, %v765_v24 }
 0x156   : > { %v1024_v25 = vsel %vm1022_vm12, %v991_v22, %v863_v23  ;;  %784 = vrot.lane.b32.xlu0 %v1592_v12, %s1294_s24  ;;  %v1247_v23 = vpop.f32.mrf.mxu0 }
 0x157   : > { %1057 = vst.msk [vmem:[%s1611_s28 + $0x8] sm:$0xff] %vm1055_vm13, %v1024_v25  ;;  %786 = vrot.lane.b32.xlu1 %v1590_v11, %s1294_s24  ;;  %v457_v37 = vadd.f32 %v1247_v23, %v1404_v33 }
 0x158   : > { %v797_v29 = vpop.permute.xlu0 %796 }
 0x159   : > { %v895_v28 = vpop.permute.xlu1 %894  ;;  %v1006_v47 = vsel %vm989_vm11, %v973_v46, %v797_v29  ;;  %vm555_vm2 = vcmp.gt.f32.partialorder %v457_v37, 0.0 }
 0x15a   : > { %v1040_v35 = vsel %vm1022_vm12, %v1007_v45, %v895_v28  ;;  %816 = vrot.lane.b32.xlu0 %v1600_v20, %s1294_s24  ;;  %v451_v45 = vpop.f32.mrf.mxu0  ;;  %v1271_v28 = vpop.f32.mrf.mxu1 }
 0x15b   : > { %1073 = vst.msk [vmem:[%s1611_s28 + $0x88] sm:$0xff] %vm1055_vm13, %v1040_v35  ;;  %818 = vrot.lane.b32.xlu1 %v1598_v19, %s1294_s24  ;;  %v452_v44 = vadd.f32 %v1404_v33, %v451_v45  ;;  %v537_v46 = vadd.f32 %v1271_v28, %v1404_v33 }
 0x15c   : > { %v861_v40 = vpop.permute.xlu0 %860 }
 0x15d   : > { %v675_v39 = vpop.permute.xlu1 %674  ;;  %v1023_v43 = vsel %vm1022_vm12, %v990_v38, %v861_v40  ;;  %v586_v48 = vmul.f32 0.1, %v452_v44  ;;  %vm554_vm3 = vcmp.gt.f32.partialorder %v452_v44, 0.0  ;;  %vm571_vm4 = vcmp.gt.f32.partialorder %v537_v46, 0.0 }
 0x15e   : > { %1056 = vst.msk [vmem:[%s1611_s28] sm:$0xff] %vm1055_vm13, %v1023_v43  ;;  %880 = vrot.lane.b32.xlu0 %v1592_v12, %s1295_s25  ;;  %v960_v10 = vsel %vm956_vm10, %v1441_v58, %v675_v39 }
 0x15f   : > { %882 = vrot.lane.b32.xlu1 %v1590_v11, %s1295_s25  ;;  %v1719_v60 = vsel %vm554_vm3, %v452_v44, %v586_v48 }
 0x160   : > { %v893_v56 = vpop.permute.xlu0 %892 }
 0x161   : > { %v707_v55 = vpop.permute.xlu1 %706  ;;  %v1039_v61 = vsel %vm1022_vm12, %v1006_v47, %v893_v56  ;;  %v603_v56 = vmul.f32 0.1, %v537_v46 }
 0x162   : > { %1072 = vst.msk [vmem:[%s1611_s28 + $0x80] sm:$0xff] %vm1055_vm13, %v1039_v61  ;;  %912 = vrot.lane.b32.xlu0 %v1600_v20, %s1295_s25  ;;  %v976_v24 = vsel %vm956_vm10, %v1448_v62, %v707_v55 }
 0x163   : > { %914 = vrot.lane.b32.xlu1 %v1598_v19, %s1295_s25 }
 0x164   : > { %v705_v63 = vpop.permute.xlu0 %704 }
 0x165   : > { %v771_v49 = vpop.permute.xlu1 %770  ;;  %v975_v62 = vsel %vm956_vm10, %v1454_v0, %v705_v63  ;;  %v531_v0 = vpop.f32.mrf.mxu1 }
 0x166   : > { %692 = vrot.lane.b32.xlu0 %v1659_v5, %s1293_s23  ;;  %v993_v13 = vsel %vm989_vm11, %v960_v10, %v771_v49  ;;  %v532_v47 = vadd.f32 %v1404_v33, %v531_v0  ;;  %v1725_v49 = vsel %vm571_vm4, %v537_v46, %v603_v56 }
 0x167   : > { %694 = vrot.lane.b32.xlu1 %v1657_v4, %s1293_s23 }
 0x168   : > { %v769_v7 = vpop.permute.xlu0 %768  ;;  %v602_v57 = vmul.f32 0.1, %v532_v47  ;;  %vm570_vm5 = vcmp.gt.f32.partialorder %v532_v47, 0.0 }
 0x169   : > { %v803_v6 = vpop.permute.xlu1 %802 }
 0x16a   : > { %724 = vrot.lane.b32.xlu0 %v1667_v9, %s1293_s23  ;;  %v1009_v58 = vsel %vm989_vm11, %v976_v24, %v803_v6  ;;  %v1727_v63 = vsel %vm570_vm5, %v532_v47, %v602_v57 }
 0x16b   : > { %726 = vrot.lane.b32.xlu1 %v1665_v8, %s1293_s23 }
 0x16c   : > { %v801_v21 = vpop.permute.xlu0 %800 }
 0x16d   : > { %v867_v18 = vpop.permute.xlu1 %866  ;;  %v1008_v29 = vsel %vm989_vm11, %v975_v62, %v801_v21 }
 0x16e   : > { %v1026_v22 = vsel %vm1022_vm12, %v993_v13, %v867_v18  ;;  %788 = vrot.lane.b32.xlu0 %v1659_v5, %s1294_s24 }
 0x16f   : > { %1059 = vst.msk [vmem:[%s1611_s28 + $0x18] sm:$0xff] %vm1055_vm13, %v1026_v22  ;;  %790 = vrot.lane.b32.xlu1 %v1657_v4, %s1294_s24 }
 0x170   : > { %v865_v26 = vpop.permute.xlu0 %864 }
 0x171   : > { %v899_v25 = vpop.permute.xlu1 %898 }
 0x172   : > { %v1042_v27 = vsel %vm1022_vm12, %v1009_v58, %v899_v25  ;;  %820 = vrot.lane.b32.xlu0 %v1667_v9, %s1294_s24 }
 0x173   : > { %1075 = vst.msk [vmem:[%s1611_s28 + $0x98] sm:$0xff] %vm1055_vm13, %v1042_v27  ;;  %822 = vrot.lane.b32.xlu1 %v1665_v8, %s1294_s24 }
 0x174   : > { %v897_v36 = vpop.permute.xlu0 %896 }
 0x175   : > { %v673_v35 = vpop.permute.xlu1 %672  ;;  %v1041_v39 = vsel %vm1022_vm12, %v1008_v29, %v897_v36 }
 0x176   : > { %v959_v38 = vsel %vm956_vm10, %v1460_v1, %v673_v35  ;;  %1074 = vst.msk [vmem:[%s1611_s28 + $0x90] sm:$0xff] %vm1055_vm13, %v1041_v39  ;;  %884 = vrot.lane.b32.xlu0 %v1659_v5, %s1295_s25  ;;  %v587_v1 = vmul.f32 0.1, %v457_v37 }
 0x177   : > { %v992_v40 = vsel %vm989_vm11, %v959_v38, %v769_v7  ;;  %886 = vrot.lane.b32.xlu1 %v1657_v4, %s1295_s25 }
 0x178   : > { %v1025_v41 = vsel %vm1022_vm12, %v992_v40, %v865_v26  ;;  %v677_v43 = vpop.permute.xlu0 %676  ;;  %v1717_v59 = vsel %vm555_vm2, %v457_v37, %v587_v1 }
 0x179   : > { %1058 = vst.msk [vmem:[%s1611_s28 + $0x10] sm:$0xff] %vm1055_vm13, %v1025_v41  ;;  %v679_v42 = vpop.permute.xlu1 %678  ;;  %v961_v7 = vsel %vm956_vm10, %v1484_v15, %v677_v43 }
 0x17a   : > { %916 = vrot.lane.b32.xlu0 %v1667_v9, %s1295_s25  ;;  %v962_v6 = vsel %vm956_vm10, %v1482_v14, %v679_v42 }
 0x17b   : > { %918 = vrot.lane.b32.xlu1 %v1665_v8, %s1295_s25 }
 0x17c   : > { %v709_v55 = vpop.permute.xlu0 %708 }
 0x17d   : > { %v711_v50 = vpop.permute.xlu1 %710  ;;  %v977_v15 = vsel %vm956_vm10, %v1492_v17, %v709_v55 }
 0x17e   : > { %696 = vrot.lane.b32.xlu0 %v1719_v60, %s1293_s23  ;;  %v978_v14 = vsel %vm956_vm10, %v1490_v16, %v711_v50 }
 0x17f   : > { %698 = vrot.lane.b32.xlu1 %v1717_v59, %s1293_s23 }
 0x180   : > { %v773_v61 = vpop.permute.xlu0 %772 }
 0x181   : > { %v775_v33 = vpop.permute.xlu1 %774  ;;  %v994_v13 = vsel %vm989_vm11, %v961_v7, %v773_v61 }
 0x182   : > { %728 = vrot.lane.b32.xlu0 %v1727_v63, %s1293_s23  ;;  %v995_v10 = vsel %vm989_vm11, %v962_v6, %v775_v33 }
 0x183   : > { %730 = vrot.lane.b32.xlu1 %v1725_v49, %s1293_s23 }
 0x184   : > { %v805_v3 = vpop.permute.xlu0 %804 }
 0x185   : > { %v807_v2 = vpop.permute.xlu1 %806  ;;  %v1010_v58 = vsel %vm989_vm11, %v977_v15, %v805_v3 }
 0x186   : > { %792 = vrot.lane.b32.xlu0 %v1719_v60, %s1294_s24  ;;  %v1011_v24 = vsel %vm989_vm11, %v978_v14, %v807_v2 }
 0x187   : > { %794 = vrot.lane.b32.xlu1 %v1717_v59, %s1294_s24 }
 0x188   : > { %v869_v21 = vpop.permute.xlu0 %868 }
 0x189   : > { %v871_v18 = vpop.permute.xlu1 %870  ;;  %v1027_v23 = vsel %vm1022_vm12, %v994_v13, %v869_v21 }
 0x18a   : > { %v1028_v22 = vsel %vm1022_vm12, %v995_v10, %v871_v18  ;;  %1060 = vst.msk [vmem:[%s1611_s28 + $0x20] sm:$0xff] %vm1055_vm13, %v1027_v23  ;;  %824 = vrot.lane.b32.xlu0 %v1727_v63, %s1294_s24 }
 0x18b   : > { %1061 = vst.msk [vmem:[%s1611_s28 + $0x28] sm:$0xff] %vm1055_vm13, %v1028_v22  ;;  %826 = vrot.lane.b32.xlu1 %v1725_v49, %s1294_s24 }
 0x18c   : > { %v901_v26 = vpop.permute.xlu0 %900 }
 0x18d   : > { %v903_v25 = vpop.permute.xlu1 %902  ;;  %v1043_v45 = vsel %vm1022_vm12, %v1010_v58, %v901_v26 }
 0x18e   : > { %v1044_v27 = vsel %vm1022_vm12, %v1011_v24, %v903_v25  ;;  %1076 = vst.msk [vmem:[%s1611_s28 + $0xa0] sm:$0xff] %vm1055_vm13, %v1043_v45  ;;  %888 = vrot.lane.b32.xlu0 %v1719_v60, %s1295_s25 }
 0x18f   : > { %1077 = vst.msk [vmem:[%s1611_s28 + $0xa8] sm:$0xff] %vm1055_vm13, %v1044_v27  ;;  %890 = vrot.lane.b32.xlu1 %v1717_v59, %s1295_s25 }
 0x190   : > { %v681_v17 = vpop.permute.xlu0 %680 }
 0x191   : > { %v683_v16 = vpop.permute.xlu1 %682  ;;  %v963_v38 = vsel %vm956_vm10, %v1520_v31, %v681_v17 }
 0x192   : > { %920 = vrot.lane.b32.xlu0 %v1727_v63, %s1295_s25  ;;  %v964_v44 = vsel %vm956_vm10, %v1518_v30, %v683_v16 }
 0x193   : > { %922 = vrot.lane.b32.xlu1 %v1725_v49, %s1295_s25 }
 0x194   : > { %v713_v62 = vpop.permute.xlu0 %712 }
 0x195   : > { %v715_v28 = vpop.permute.xlu1 %714  ;;  %v979_v31 = vsel %vm956_vm10, %v1528_v34, %v713_v62 }
 0x196   : > { %v980_v30 = vsel %vm956_vm10, %v1526_v32, %v715_v28 }
 0x198   : > { %v777_v35 = vpop.permute.xlu0 %776 }
 0x199   : > { %v779_v29 = vpop.permute.xlu1 %778  ;;  %v996_v40 = vsel %vm989_vm11, %v963_v38, %v777_v35 }
 0x19a   : > { %v997_v39 = vsel %vm989_vm11, %v964_v44, %v779_v29 }
 0x19c   : > { %v809_v37 = vpop.permute.xlu0 %808 }
 0x19d   : > { %v811_v36 = vpop.permute.xlu1 %810  ;;  %v1012_v48 = vsel %vm989_vm11, %v979_v31, %v809_v37 }
 0x19e   : > { %v1013_v1 = vsel %vm989_vm11, %v980_v30, %v811_v36 }
 0x1a0   : > { %v873_v41 = vpop.permute.xlu0 %872 }
 0x1a1   : > { %v875_v0 = vpop.permute.xlu1 %874  ;;  %v1029_v43 = vsel %vm1022_vm12, %v996_v40, %v873_v41 }
 0x1a2   : > { %v1030_v42 = vsel %vm1022_vm12, %v997_v39, %v875_v0  ;;  %1062 = vst.msk [vmem:[%s1611_s28 + $0x30] sm:$0xff] %vm1055_vm13, %v1029_v43 }
 0x1a3   : > { %1063 = vst.msk [vmem:[%s1611_s28 + $0x38] sm:$0xff] %vm1055_vm13, %v1030_v42 }
 0x1a4   : > { %v905_v47 = vpop.permute.xlu0 %904 }
 0x1a5   : > { %v907_v46 = vpop.permute.xlu1 %906  ;;  %v1045_v55 = vsel %vm1022_vm12, %v1012_v48, %v905_v47 }
 0x1a6   : > { %v1046_v50 = vsel %vm1022_vm12, %v1013_v1, %v907_v46  ;;  %1078 = vst.msk [vmem:[%s1611_s28 + $0xb0] sm:$0xff] %vm1055_vm13, %v1045_v55 }
 0x1a7   : > { %1079 = vst.msk [vmem:[%s1611_s28 + $0xb8] sm:$0xff] %vm1055_vm13, %v1046_v50 }
 0x1a8   : > { %v685_v32 = vpop.permute.xlu0 %684 }
 0x1a9   : > { %v687_v56 = vpop.permute.xlu1 %686  ;;  %v965_v7 = vsel %vm956_vm10, %v1556_v52, %v685_v32 }
 0x1aa   : > { %v966_v6 = vsel %vm956_vm10, %v1554_v51, %v687_v56 }
 0x1ac   : > { %v717_v34 = vpop.permute.xlu0 %716 }
 0x1ad   : > { %v719_v57 = vpop.permute.xlu1 %718  ;;  %v981_v52 = vsel %vm956_vm10, %v1564_v54, %v717_v34 }
 0x1ae   : > { %v982_v51 = vsel %vm956_vm10, %v1562_v53, %v719_v57 }
 0x1b0   : > { %v781_v61 = vpop.permute.xlu0 %780 }
 0x1b1   : > { %v783_v33 = vpop.permute.xlu1 %782  ;;  %v998_v13 = vsel %vm989_vm11, %v965_v7, %v781_v61 }
 0x1b2   : > { %v999_v10 = vsel %vm989_vm11, %v966_v6, %v783_v33 }
 0x1b4   : > { %v813_v3 = vpop.permute.xlu0 %812 }
 0x1b5   : > { %v815_v2 = vpop.permute.xlu1 %814  ;;  %v1014_v15 = vsel %vm989_vm11, %v981_v52, %v813_v3 }
 0x1b6   : > { %v1015_v14 = vsel %vm989_vm11, %v982_v51, %v815_v2 }
 0x1b8   : > { %v877_v21 = vpop.permute.xlu0 %876 }
 0x1b9   : > { %v879_v18 = vpop.permute.xlu1 %878  ;;  %v1031_v23 = vsel %vm1022_vm12, %v998_v13, %v877_v21 }
 0x1ba   : > { %v1032_v22 = vsel %vm1022_vm12, %v999_v10, %v879_v18  ;;  %1064 = vst.msk [vmem:[%s1611_s28 + $0x40] sm:$0xff] %vm1055_vm13, %v1031_v23 }
 0x1bb   : > { %1065 = vst.msk [vmem:[%s1611_s28 + $0x48] sm:$0xff] %vm1055_vm13, %v1032_v22 }
 0x1bc   : > { %v909_v58 = vpop.permute.xlu0 %908 }
 0x1bd   : > { %v911_v24 = vpop.permute.xlu1 %910  ;;  %v1047_v26 = vsel %vm1022_vm12, %v1014_v15, %v909_v58 }
 0x1be   : > { %v1048_v25 = vsel %vm1022_vm12, %v1015_v14, %v911_v24  ;;  %1080 = vst.msk [vmem:[%s1611_s28 + $0xc0] sm:$0xff] %vm1055_vm13, %v1047_v26 }
 0x1bf   : > { %1081 = vst.msk [vmem:[%s1611_s28 + $0xc8] sm:$0xff] %vm1055_vm13, %v1048_v25 }
 0x1c0   : > { %v689_v53 = vpop.permute.xlu0 %688 }
 0x1c1   : > { %v691_v27 = vpop.permute.xlu1 %690  ;;  %v967_v35 = vsel %vm956_vm10, %v1592_v12, %v689_v53 }
 0x1c2   : > { %v968_v29 = vsel %vm956_vm10, %v1590_v11, %v691_v27 }
 0x1c4   : > { %v721_v54 = vpop.permute.xlu0 %720 }
 0x1c5   : > { %v723_v45 = vpop.permute.xlu1 %722  ;;  %v983_v12 = vsel %vm956_vm10, %v1600_v20, %v721_v54 }
 0x1c6   : > { %v984_v11 = vsel %vm956_vm10, %v1598_v19, %v723_v45 }
 0x1c8   : > { %v785_v17 = vpop.permute.xlu0 %784 }
 0x1c9   : > { %v787_v16 = vpop.permute.xlu1 %786  ;;  %v1000_v37 = vsel %vm989_vm11, %v967_v35, %v785_v17 }
 0x1ca   : > { %v1001_v36 = vsel %vm989_vm11, %v968_v29, %v787_v16 }
 0x1cc   : > { %v817_v62 = vpop.permute.xlu0 %816 }
 0x1cd   : > { %v819_v28 = vpop.permute.xlu1 %818  ;;  %v1016_v41 = vsel %vm989_vm11, %v983_v12, %v817_v62 }
 0x1ce   : > { %v1017_v0 = vsel %vm989_vm11, %v984_v11, %v819_v28 }
 0x1d0   : > { %v881_v38 = vpop.permute.xlu0 %880 }
 0x1d1   : > { %v883_v44 = vpop.permute.xlu1 %882  ;;  %v1033_v40 = vsel %vm1022_vm12, %v1000_v37, %v881_v38 }
 0x1d2   : > { %v1034_v39 = vsel %vm1022_vm12, %v1001_v36, %v883_v44  ;;  %1066 = vst.msk [vmem:[%s1611_s28 + $0x50] sm:$0xff] %vm1055_vm13, %v1033_v40 }
 0x1d3   : > { %1067 = vst.msk [vmem:[%s1611_s28 + $0x58] sm:$0xff] %vm1055_vm13, %v1034_v39 }
 0x1d4   : > { %v913_v43 = vpop.permute.xlu0 %912 }
 0x1d5   : > { %v915_v42 = vpop.permute.xlu1 %914  ;;  %v1049_v31 = vsel %vm1022_vm12, %v1016_v41, %v913_v43 }
 0x1d6   : > { %v1050_v30 = vsel %vm1022_vm12, %v1017_v0, %v915_v42  ;;  %1082 = vst.msk [vmem:[%s1611_s28 + $0xd0] sm:$0xff] %vm1055_vm13, %v1049_v31 }
 0x1d7   : > { %1083 = vst.msk [vmem:[%s1611_s28 + $0xd8] sm:$0xff] %vm1055_vm13, %v1050_v30 }
 0x1d8   : > { %v693_v19 = vpop.permute.xlu0 %692 }
 0x1d9   : > { %v695_v1 = vpop.permute.xlu1 %694  ;;  %v969_v32 = vsel %vm956_vm10, %v1659_v5, %v693_v19 }
 0x1da   : > { %v970_v56 = vsel %vm956_vm10, %v1657_v4, %v695_v1 }
 0x1dc   : > { %v725_v20 = vpop.permute.xlu0 %724 }
 0x1dd   : > { %v727_v48 = vpop.permute.xlu1 %726  ;;  %v985_v5 = vsel %vm956_vm10, %v1667_v9, %v725_v20 }
 0x1de   : > { %v986_v4 = vsel %vm956_vm10, %v1665_v8, %v727_v48 }
 0x1e0   : > { %v789_v47 = vpop.permute.xlu0 %788 }
 0x1e1   : > { %v791_v46 = vpop.permute.xlu1 %790  ;;  %v1002_v34 = vsel %vm989_vm11, %v969_v32, %v789_v47 }
 0x1e2   : > { %v1003_v57 = vsel %vm989_vm11, %v970_v56, %v791_v46 }
 0x1e4   : > { %v821_v55 = vpop.permute.xlu0 %820 }
 0x1e5   : > { %v823_v50 = vpop.permute.xlu1 %822  ;;  %v1018_v7 = vsel %vm989_vm11, %v985_v5, %v821_v55 }
 0x1e6   : > { %v1019_v6 = vsel %vm989_vm11, %v986_v4, %v823_v50 }
 0x1e8   : > { %v885_v61 = vpop.permute.xlu0 %884 }
 0x1e9   : > { %v887_v33 = vpop.permute.xlu1 %886  ;;  %v1035_v3 = vsel %vm1022_vm12, %v1002_v34, %v885_v61 }
 0x1ea   : > { %v1036_v2 = vsel %vm1022_vm12, %v1003_v57, %v887_v33  ;;  %1068 = vst.msk [vmem:[%s1611_s28 + $0x60] sm:$0xff] %vm1055_vm13, %v1035_v3 }
 0x1eb   : > { %1069 = vst.msk [vmem:[%s1611_s28 + $0x68] sm:$0xff] %vm1055_vm13, %v1036_v2 }
 0x1ec   : > { %v917_v13 = vpop.permute.xlu0 %916 }
 0x1ed   : > { %v919_v10 = vpop.permute.xlu1 %918  ;;  %v1051_v21 = vsel %vm1022_vm12, %v1018_v7, %v917_v13 }
 0x1ee   : > { %v1052_v18 = vsel %vm1022_vm12, %v1019_v6, %v919_v10  ;;  %1084 = vst.msk [vmem:[%s1611_s28 + $0xe0] sm:$0xff] %vm1055_vm13, %v1051_v21 }
 0x1ef   : > { %1085 = vst.msk [vmem:[%s1611_s28 + $0xe8] sm:$0xff] %vm1055_vm13, %v1052_v18 }
 0x1f0   : > { %v697_v8 = vpop.permute.xlu0 %696 }
 0x1f1   : > { %v699_v22 = vpop.permute.xlu1 %698  ;;  %v971_v58 = vsel %vm956_vm10, %v1719_v60, %v697_v8 }
 0x1f2   : > { %v972_v24 = vsel %vm956_vm10, %v1717_v59, %v699_v22 }
 0x1f4   : > { %v729_v9 = vpop.permute.xlu0 %728 }
 0x1f5   : > { %v731_v23 = vpop.permute.xlu1 %730  ;;  %v987_v60 = vsel %vm956_vm10, %v1727_v63, %v729_v9 }
 0x1f6   : > { %v988_v59 = vsel %vm956_vm10, %v1725_v49, %v731_v23 }
 0x1f8   : > { %v793_v52 = vpop.permute.xlu0 %792 }
 0x1f9   : > { %v795_v51 = vpop.permute.xlu1 %794  ;;  %v1004_v26 = vsel %vm989_vm11, %v971_v58, %v793_v52 }
 0x1fa   : > { %v1005_v25 = vsel %vm989_vm11, %v972_v24, %v795_v51 }
 0x1fc   : > { %v825_v15 = vpop.permute.xlu0 %824 }
 0x1fd   : > { %v827_v14 = vpop.permute.xlu1 %826  ;;  %v1020_v17 = vsel %vm989_vm11, %v987_v60, %v825_v15 }
 0x1fe   : > { %v1021_v16 = vsel %vm989_vm11, %v988_v59, %v827_v14 }
 0x200   : > { %v889_v53 = vpop.permute.xlu0 %888 }
 0x201   : > { %v891_v27 = vpop.permute.xlu1 %890  ;;  %v1037_v54 = vsel %vm1022_vm12, %v1004_v26, %v889_v53 }
 0x202   : > { %v1038_v45 = vsel %vm1022_vm12, %v1005_v25, %v891_v27  ;;  %1070 = vst.msk [vmem:[%s1611_s28 + $0x70] sm:$0xff] %vm1055_vm13, %v1037_v54 }
 0x203   : > { %1071 = vst.msk [vmem:[%s1611_s28 + $0x78] sm:$0xff] %vm1055_vm13, %v1038_v45 }
 0x204   : > { %v921_v62 = vpop.permute.xlu0 %920 }
 0x205   : > { %v923_v28 = vpop.permute.xlu1 %922  ;;  %v1053_v35 = vsel %vm1022_vm12, %v1020_v17, %v921_v62 }
 0x206   : > { %v1054_v29 = vsel %vm1022_vm12, %v1021_v16, %v923_v28  ;;  %1086 = vst.msk [vmem:[%s1611_s28 + $0xf0] sm:$0xff] %vm1055_vm13, %v1053_v35 }
 0x207   : > { %1087 = vst.msk [vmem:[%s1611_s28 + $0xf8] sm:$0xff] %vm1055_vm13, %v1054_v29 }
 0x208 PF: > { %s13_s12 = sadd.s32 1, %s1291_s12  }
 0x209   : > { %p10_p4 = scmp.ge.s32.totalorder %s13_s12, 4  }
 0x20b   :  { %12 = sbr.rel (!%p10_p4) target bundleno = 1 (0x1), region = 62 }

</bundles_post_ra>
